<compile_context>
chip_gen: v7x
topology: tpu7x:2x2x1
jax: 0.10.0
libtpu: 0.0.40
codegen_flags: <defaults>
</compile_context>

<pallas_src>
import functools
import math

import jax
import jax.numpy as jnp
from jax import lax
from jax.experimental import pallas as pl
from jax.experimental.pallas import tpu as pltpu


def _embedding_kernel(ids_ref, table_ref, o_ref, *, tokens_per_block, scale):
    """One grid step: gather `tokens_per_block` rows of the resident table.

    ids_ref   : SMEM int32 (n_tokens_padded,)   -- scalar-prefetched token ids
    table_ref : VMEM (vocab_size, d_model)      -- resident across grid steps
    o_ref     : VMEM (tokens_per_block, d_model)
    """
    base = pl.program_id(0) * tokens_per_block

    def body(t, carry):
        tok = ids_ref[base + t]                    # scalar read from SMEM
        row = table_ref[pl.ds(tok, 1), :]          # (1, d_model) dynamic row gather
        o_ref[pl.ds(t, 1), :] = (row * scale).astype(o_ref.dtype)
        return carry

    # Short fixed trip-count: unroll so the LLO scheduler sees all the loads.
    lax.fori_loop(0, tokens_per_block, body, 0, unroll=True)


def embedding_forward(ids, table, *, tokens_per_block=8):
    """PyTorch-equivalent Embedding forward: table[ids] * sqrt(d_model).

    ids   : (B, S) integer token ids
    table : (vocab_size, d_model) embedding weights
    returns (B, S, d_model)
    """
    B, S = ids.shape
    V, D = table.shape
    scale = math.sqrt(D)

    # The resident-table strategy only works for tables that fit comfortably in
    # VMEM (remember v7x has only 64 MiB total / ~32 MiB scoped by default).
    table_bytes = V * D * jnp.dtype(table.dtype).itemsize
    assert table_bytes <= 8 * 1024 * 1024, "embedding table too large for VMEM-resident path"
    # TODO(synk): for large vocab tables, switch to a streaming gather — keep
    # the table in HBM with a data-dependent index_map
    # (pl.BlockSpec((pl.Element(1), D), lambda i, ids: (ids[i], 0))) or a manual
    # pltpu.make_async_copy per-row DMA gather — instead of the resident table.

    n_tok = B * S
    ids_flat = ids.reshape(n_tok).astype(jnp.int32)
    n_pad = pl.cdiv(n_tok, tokens_per_block) * tokens_per_block
    if n_pad != n_tok:
        ids_flat = jnp.pad(ids_flat, (0, n_pad - n_tok))   # pad with token 0

    kernel = functools.partial(
        _embedding_kernel, tokens_per_block=tokens_per_block, scale=scale)

    out_flat = pl.pallas_call(
        kernel,
        out_shape=jax.ShapeDtypeStruct((n_pad, D), table.dtype),
        grid_spec=pltpu.PrefetchScalarGridSpec(
            num_scalar_prefetch=1,                 # ids -> SMEM, passed to index_maps
            grid=(n_pad // tokens_per_block,),
            # Whole table, constant block index -> DMA'd once, stays in VMEM.
            in_specs=[pl.BlockSpec((V, D), lambda i, ids_smem: (0, 0))],
            # Lane-dense (tokens_per_block, d_model) output slabs, disjoint per step.
            out_specs=pl.BlockSpec((tokens_per_block, D),
                                   lambda i, ids_smem: (i, 0)),
        ),
        compiler_params=pltpu.CompilerParams(
            dimension_semantics=("parallel",)),
    )(ids_flat, table)

    return out_flat[:n_tok].reshape(B, S, D)


if __name__ == "__main__":
    vocab_size, d_model = 100, 32
    B, S = 2, 8

    key = jax.random.PRNGKey(0)
    k_tab, k_ids = jax.random.split(key)
    table = jax.random.normal(k_tab, (vocab_size, d_model), jnp.float32) * 0.02
    ids = jax.random.randint(k_ids, (B, S), 0, vocab_size, dtype=jnp.int32)

    out = embedding_forward(ids, table, tokens_per_block=8)
    out = jax.block_until_ready(out)

    # Reference: nn.Embedding lookup * sqrt(d_model)
    ref = jnp.take(table, ids.reshape(-1), axis=0).reshape(B, S, d_model) * math.sqrt(d_model)

    assert out.shape == (B, S, d_model)
    assert jnp.allclose(out, ref, atol=1e-5, rtol=1e-5), float(jnp.max(jnp.abs(out - ref)))
    print("KERNEL_OK")
</pallas_src>

<mosaic_0001>
module attributes {stable_mosaic.version = 11 : i64} {
  func.func @_embedding_kernel(%arg0: i32, %arg1: memref<16xi32, #tpu.memory_space<smem>>, %arg2: memref<100x32xf32, #tpu.memory_space<vmem>>, %arg3: memref<8x32xf32, #tpu.memory_space<vmem>>) attributes {dimension_semantics = [#tpu.dimension_semantics<parallel>], iteration_bounds = array<i64: 2>, scalar_prefetch = 1 : i64, scratch_operands = 0 : i64, tpu.core_type = #tpu.core_type<tc>, window_params = [{pipeline_mode = #tpu.pipeline_mode<synchronous>, transform_indices = @transform_0, window_bounds = array<i64: 100, 32>}, {transform_indices = @transform_1, window_bounds = array<i64: 8, 32>}]} {
    %c8_i32 = arith.constant 8 : i32
    %0 = arith.muli %arg0, %c8_i32 : i32
    %c0_i32 = arith.constant 0 : i32
    %1 = arith.addi %0, %c0_i32 : i32
    %2 = arith.index_cast %1 : i32 to index
    %3 = memref.load %arg1[%2] : memref<16xi32, #tpu.memory_space<smem>>
    %4 = arith.index_cast %3 : i32 to index
    %c0 = arith.constant 0 : index
    %5 = vector.load %arg2[%4, %c0] : memref<100x32xf32, #tpu.memory_space<vmem>>, vector<1x32xf32>
    %cst = arith.constant 5.65685415 : f32
    %6 = vector.broadcast %cst : f32 to vector<1x32xf32>
    %7 = arith.mulf %5, %6 : vector<1x32xf32>
    %8 = arith.index_cast %c0_i32 : i32 to index
    %c0_0 = arith.constant 0 : index
    %9 = vector.load %arg3[%8, %c0_0] : memref<8x32xf32, #tpu.memory_space<vmem>>, vector<1x32xf32>
    tpu.vector_store %arg3[%8, %c0_0], %7 {strides = array<i32>} : memref<8x32xf32, #tpu.memory_space<vmem>>, vector<1x32xf32>,
    %c1_i32 = arith.constant 1 : i32
    %10 = arith.addi %0, %c1_i32 : i32
    %11 = arith.index_cast %10 : i32 to index
    %12 = memref.load %arg1[%11] : memref<16xi32, #tpu.memory_space<smem>>
    %13 = arith.index_cast %12 : i32 to index
    %c0_1 = arith.constant 0 : index
    %14 = vector.load %arg2[%13, %c0_1] : memref<100x32xf32, #tpu.memory_space<vmem>>, vector<1x32xf32>
    %cst_2 = arith.constant 5.65685415 : f32
    %15 = vector.broadcast %cst_2 : f32 to vector<1x32xf32>
    %16 = arith.mulf %14, %15 : vector<1x32xf32>
    %17 = arith.index_cast %c1_i32 : i32 to index
    %c0_3 = arith.constant 0 : index
    %18 = vector.load %arg3[%17, %c0_3] : memref<8x32xf32, #tpu.memory_space<vmem>>, vector<1x32xf32>
    tpu.vector_store %arg3[%17, %c0_3], %16 {strides = array<i32>} : memref<8x32xf32, #tpu.memory_space<vmem>>, vector<1x32xf32>,
    %c2_i32 = arith.constant 2 : i32
    %19 = arith.addi %0, %c2_i32 : i32
    %20 = arith.index_cast %19 : i32 to index
    %21 = memref.load %arg1[%20] : memref<16xi32, #tpu.memory_space<smem>>
    %22 = arith.index_cast %21 : i32 to index
    %c0_4 = arith.constant 0 : index
    %23 = vector.load %arg2[%22, %c0_4] : memref<100x32xf32, #tpu.memory_space<vmem>>, vector<1x32xf32>
    %cst_5 = arith.constant 5.65685415 : f32
    %24 = vector.broadcast %cst_5 : f32 to vector<1x32xf32>
    %25 = arith.mulf %23, %24 : vector<1x32xf32>
    %26 = arith.index_cast %c2_i32 : i32 to index
    %c0_6 = arith.constant 0 : index
    %27 = vector.load %arg3[%26, %c0_6] : memref<8x32xf32, #tpu.memory_space<vmem>>, vector<1x32xf32>
    tpu.vector_store %arg3[%26, %c0_6], %25 {strides = array<i32>} : memref<8x32xf32, #tpu.memory_space<vmem>>, vector<1x32xf32>,
    %c3_i32 = arith.constant 3 : i32
    %28 = arith.addi %0, %c3_i32 : i32
    %29 = arith.index_cast %28 : i32 to index
    %30 = memref.load %arg1[%29] : memref<16xi32, #tpu.memory_space<smem>>
    %31 = arith.index_cast %30 : i32 to index
    %c0_7 = arith.constant 0 : index
    %32 = vector.load %arg2[%31, %c0_7] : memref<100x32xf32, #tpu.memory_space<vmem>>, vector<1x32xf32>
    %cst_8 = arith.constant 5.65685415 : f32
    %33 = vector.broadcast %cst_8 : f32 to vector<1x32xf32>
    %34 = arith.mulf %32, %33 : vector<1x32xf32>
    %35 = arith.index_cast %c3_i32 : i32 to index
    %c0_9 = arith.constant 0 : index
    %36 = vector.load %arg3[%35, %c0_9] : memref<8x32xf32, #tpu.memory_space<vmem>>, vector<1x32xf32>
    tpu.vector_store %arg3[%35, %c0_9], %34 {strides = array<i32>} : memref<8x32xf32, #tpu.memory_space<vmem>>, vector<1x32xf32>,
    %c4_i32 = arith.constant 4 : i32
    %37 = arith.addi %0, %c4_i32 : i32
    %38 = arith.index_cast %37 : i32 to index
    %39 = memref.load %arg1[%38] : memref<16xi32, #tpu.memory_space<smem>>
    %40 = arith.index_cast %39 : i32 to index
    %c0_10 = arith.constant 0 : index
    %41 = vector.load %arg2[%40, %c0_10] : memref<100x32xf32, #tpu.memory_space<vmem>>, vector<1x32xf32>
    %cst_11 = arith.constant 5.65685415 : f32
    %42 = vector.broadcast %cst_11 : f32 to vector<1x32xf32>
    %43 = arith.mulf %41, %42 : vector<1x32xf32>
    %44 = arith.index_cast %c4_i32 : i32 to index
    %c0_12 = arith.constant 0 : index
    %45 = vector.load %arg3[%44, %c0_12] : memref<8x32xf32, #tpu.memory_space<vmem>>, vector<1x32xf32>
    tpu.vector_store %arg3[%44, %c0_12], %43 {strides = array<i32>} : memref<8x32xf32, #tpu.memory_space<vmem>>, vector<1x32xf32>,
    %c5_i32 = arith.constant 5 : i32
    %46 = arith.addi %0, %c5_i32 : i32
    %47 = arith.index_cast %46 : i32 to index
    %48 = memref.load %arg1[%47] : memref<16xi32, #tpu.memory_space<smem>>
    %49 = arith.index_cast %48 : i32 to index
    %c0_13 = arith.constant 0 : index
    %50 = vector.load %arg2[%49, %c0_13] : memref<100x32xf32, #tpu.memory_space<vmem>>, vector<1x32xf32>
    %cst_14 = arith.constant 5.65685415 : f32
    %51 = vector.broadcast %cst_14 : f32 to vector<1x32xf32>
    %52 = arith.mulf %50, %51 : vector<1x32xf32>
    %53 = arith.index_cast %c5_i32 : i32 to index
    %c0_15 = arith.constant 0 : index
    %54 = vector.load %arg3[%53, %c0_15] : memref<8x32xf32, #tpu.memory_space<vmem>>, vector<1x32xf32>
    tpu.vector_store %arg3[%53, %c0_15], %52 {strides = array<i32>} : memref<8x32xf32, #tpu.memory_space<vmem>>, vector<1x32xf32>,
    %c6_i32 = arith.constant 6 : i32
    %55 = arith.addi %0, %c6_i32 : i32
    %56 = arith.index_cast %55 : i32 to index
    %57 = memref.load %arg1[%56] : memref<16xi32, #tpu.memory_space<smem>>
    %58 = arith.index_cast %57 : i32 to index
    %c0_16 = arith.constant 0 : index
    %59 = vector.load %arg2[%58, %c0_16] : memref<100x32xf32, #tpu.memory_space<vmem>>, vector<1x32xf32>
    %cst_17 = arith.constant 5.65685415 : f32
    %60 = vector.broadcast %cst_17 : f32 to vector<1x32xf32>
    %61 = arith.mulf %59, %60 : vector<1x32xf32>
    %62 = arith.index_cast %c6_i32 : i32 to index
    %c0_18 = arith.constant 0 : index
    %63 = vector.load %arg3[%62, %c0_18] : memref<8x32xf32, #tpu.memory_space<vmem>>, vector<1x32xf32>
    tpu.vector_store %arg3[%62, %c0_18], %61 {strides = array<i32>} : memref<8x32xf32, #tpu.memory_space<vmem>>, vector<1x32xf32>,
    %c7_i32 = arith.constant 7 : i32
    %64 = arith.addi %0, %c7_i32 : i32
    %65 = arith.index_cast %64 : i32 to index
    %66 = memref.load %arg1[%65] : memref<16xi32, #tpu.memory_space<smem>>
    %67 = arith.index_cast %66 : i32 to index
    %c0_19 = arith.constant 0 : index
    %68 = vector.load %arg2[%67, %c0_19] : memref<100x32xf32, #tpu.memory_space<vmem>>, vector<1x32xf32>
    %cst_20 = arith.constant 5.65685415 : f32
    %69 = vector.broadcast %cst_20 : f32 to vector<1x32xf32>
    %70 = arith.mulf %68, %69 : vector<1x32xf32>
    %71 = arith.index_cast %c7_i32 : i32 to index
    %c0_21 = arith.constant 0 : index
    %72 = vector.load %arg3[%71, %c0_21] : memref<8x32xf32, #tpu.memory_space<vmem>>, vector<1x32xf32>
    tpu.vector_store %arg3[%71, %c0_21], %70 {strides = array<i32>} : memref<8x32xf32, #tpu.memory_space<vmem>>, vector<1x32xf32>,
    %c8_i32_22 = arith.constant 8 : i32
    return
  }
  func.func @transform_0(%arg0: i32, %arg1: memref<16xi32, #tpu.memory_space<smem>>) -> (i32, i32) {
    %c0_i32 = arith.constant 0 : i32
    %c0_i32_0 = arith.constant 0 : i32
    %c0_i32_1 = arith.constant 0 : i32
    return %c0_i32, %c0_i32_0 : i32, i32
  }
  func.func @transform_1(%arg0: i32, %arg1: memref<16xi32, #tpu.memory_space<smem>>) -> (i32, i32) {
    %c0_i32 = arith.constant 0 : i32
    %c0_i32_0 = arith.constant 0 : i32
    return %arg0, %c0_i32 : i32, i32
  }
}

</mosaic_0001>

<bundles_post_ra>
// kernel: tpu_custom_call.1
= control target key start
LH: loop header
LB: loop body
LE: loop exit
PB: predicated region body
PF: predicated region fallthrough
CT: control target
= control target key end

     0   :  { %s510_s0 = inlined_call_operand.vmem [shape: s32[16], index: 0, kind: input, shape index: {}]   ;;  %s511_s1 = inlined_call_operand.vmem [shape: f32[100,32], index: 1, kind: input, shape index: {}]   ;;  %s512_s2 = inlined_call_operand.hbm [shape: f32[16,32], index: 2, kind: output, shape index: {}]  }
   0x1   :  { %s7_s11 = sshll.u32 %s510_s0, 4  ;;  %s8_s11 = int_to_ptr.vmem [resolvable:$true] %s7_s11 }
   0x2   :  { %s269_s12 = scalar_lea.vmem %s8_s11, 16  ;;  %p274_p1 = scmp.lt.s32.totalorder %s8_s11, %s8_s11 }
   0x3   :  { %p270_p0 = scmp.ne.s32.totalorder %s8_s11, %s269_s12  ;;  %p275_p2 = scmp.lt.s32.totalorder %s269_s12, %s269_s12 }
   0x5   :  { %p276_p3 = por %p275_p2, %p274_p1 }
   0x7   :  { %p277_p4 = pnand %p276_p3, %p270_p0 }
   0x9   :  { %280 = shalt.err (!%p277_p4)  }
   0xa   :  { %s347_s13 = smov [#allocation3]  }
   0xb   :  { %10 = dma.vmem_to_smem %s8_s11, 16, %s347_s13, [#allocation2] }
   0xc   :  { %325 = dma.done.wait [#allocation2], 16 }
   0xd   :  { %326 = vsyncadd [#allocation2], 4294967280 }
   0xe   :  { %12 = sfence }
   0xf   :  { %13 = vsyncpa [#allocation5], 0 }
  0x10   :  { %15 = vsyncpa [#allocation5 + $0x1], 0  ;;  %s367_s14 = smov 0   ;;  %s369_s15 = smov 0  }
  0x11   :  { %s371_s0 = smov 0   ;;  %s373_s16 = smov 0  }
  0x12 LB: > { %515 = sst [smem:[#allocation8_spill]] %s341_s0  ;;  %s388_s17 = sadd.s32 4294967295, %s345_s16   ;;  %s345_s16 = sphi %s373_s16, %s524_s16   ;;  %s341_s0 = sphi %s371_s0, %s521_s0   ;;  %s337_s15 = sphi %s369_s15, %s523_s15   ;;  %s333_s14 = sphi %s367_s14, %s522_s14  }
  0x13   : > { %s220_s18 = sadd.s32 4294967294, %s345_s16   ;;  %s392_s19 = sadd.s32 1, %s345_s16  }
  0x14   : > { %s49_s20 = sadd.s32 1, %s341_s0  ;;  %s46_s21 = ssub.s32 %s345_s16, %s392_s19 }
  0x15   : > { %p59_p5 = scmp.ne.s32.totalorder %s341_s0, %s337_s15  ;;  %p47_p6 = scmp.eq.s32.totalorder %s46_s21, 0 }
  0x16   : > { %p60_p7 = scmp.eq.s32.totalorder %s388_s17, 1  ;;  %p65_p8 = scmp.ne.s32.totalorder %s337_s15, %s333_s14 }
  0x17   : > { %p66_p9 = scmp.eq.s32.totalorder %s220_s18, 1  ;;  %p222_p12 = scmp.ge.s32.totalorder %s345_s16, 1 }
  0x18   : > { %s403_s22 = scalar_select %p47_p6, %s341_s0, %s49_s20  }
  0x19   : > { %p405_p10 = por %p60_p7, %p59_p5  ;;  %p409_p11 = por %p66_p9, %p65_p8 }
  0x1a   : > { %516 = sst [smem:[#allocation9_spill]] %s403_s22  ;;  %p87_p13 = scmp.lt.s32.totalorder %s345_s16, 3 }
  0x1c   : > { %p88_p0 = pnand %p222_p12, %p87_p13 }
  0x1d   : > { %s513_s25 = sand.u32 (!%p88_p0), 1, %s337_s15   ;;  %s224_s26 = sshll.u32 (!%p88_p0), %s388_s17, 3  ;;  %vm107_vm0 = vcmask (!%p88_p0), 253952  }
  0x1e   : > { %91 = sbr.rel (%p88_p0) target bundleno = 71 (0x47), region = 24  ;;  %s223_s27 = sshll.u32 (!%p88_p0), %s513_s25, 3 }
  0x1f   : > { %s103_s28 = sld [smem:[#allocation3 + %s224_s26]] (!%p88_p0)  ;;  %s109_s29 = sadd.s32 (!%p88_p0), 1, %s224_s26 }
  0x20   : > { %s115_s30 = sadd.s32 (!%p88_p0), 2, %s224_s26  ;;  %s110_s3 = sld [smem:[#allocation3 + %s109_s29]] (!%p88_p0) }
  0x21   : > { %s116_s4 = sld [smem:[#allocation3 + %s115_s30]] (!%p88_p0)  ;;  %s121_s5 = sadd.s32 (!%p88_p0), 3, %s224_s26 }
  0x22   : > { %s127_s6 = sadd.s32 (!%p88_p0), 4, %s224_s26  ;;  %s122_s7 = sld [smem:[#allocation3 + %s121_s5]] (!%p88_p0) }
  0x23   : > { %s128_s8 = sld [smem:[#allocation3 + %s127_s6]] (!%p88_p0)  ;;  %s133_s12 = sadd.s32 (!%p88_p0), 5, %s224_s26 }
  0x24   : > { %s134_s13 = sld [smem:[#allocation3 + %s133_s12]] (!%p88_p0)  ;;  %s139_s18 = sadd.s32 (!%p88_p0), 6, %s224_s26 }
  0x25   : > { %s104_s11 = scalar_lea.vmem %s511_s1, %s103_s28  ;;  %s140_s20 = sld [smem:[#allocation3 + %s139_s18]] }
  0x26   : > { %v105_v0 = vld [vmem:[%s104_s11] sm:$0x1]  ;;  %s145_s21 = sadd.s32 7, %s224_s26  ;;  %s111_s29 = scalar_lea.vmem %s511_s1, %s110_s3 }
  0x27   : > { %v106_v1 = vmul.f32 5.656854, %v105_v0  ;;  %s117_s5 = scalar_lea.vmem %s511_s1, %s116_s4  ;;  %s428_s6 = scalar_lea.vmem [#allocation4], %s223_s27  ;;  %v112_v2 = vld [vmem:[%s111_s29] sm:$0x1] }
  0x28   : > { %v118_v3 = vld [vmem:[%s117_s5] sm:$0x1]  ;;  %s146_s26 = sld [smem:[#allocation3 + %s145_s21]]  ;;  %v113_v4 = vmul.f32 5.656854, %v112_v2  ;;  %s123_s0 = scalar_lea.vmem %s511_s1, %s122_s7 }
  0x29   : > { %108 = vst.msk [vmem:[%s428_s6] sm:$0x1] %vm107_vm0, %v106_v1  ;;  %v119_v5 = vmul.f32 5.656854, %v118_v3  ;;  %s129_s3 = scalar_lea.vmem %s511_s1, %s128_s8  ;;  %v124_v6 = vld [vmem:[%s123_s0] sm:$0x1] }
  0x2a   : > { %v130_v7 = vld [vmem:[%s129_s3] sm:$0x1]  ;;  %114 = vst.msk [vmem:[%s428_s6 + $0x1] sm:$0x1] %vm107_vm0, %v113_v4  ;;  %v125_v8 = vmul.f32 5.656854, %v124_v6  ;;  %s135_s10 = scalar_lea.vmem %s511_s1, %s134_s13 }
  0x2b   : > { %120 = vst.msk [vmem:[%s428_s6 + $0x2] sm:$0x1] %vm107_vm0, %v119_v5  ;;  %v131_v9 = vmul.f32 5.656854, %v130_v7  ;;  %v136_v10 = vld [vmem:[%s135_s10] sm:$0x1]  ;;  %s141_s8 = scalar_lea.vmem %s511_s1, %s140_s20 }
  0x2c   : > { %126 = vst.msk [vmem:[%s428_s6 + $0x3] sm:$0x1] %vm107_vm0, %v125_v8  ;;  %v137_v11 = vmul.f32 5.656854, %v136_v10  ;;  %v142_v12 = vld [vmem:[%s141_s8] sm:$0x1] }
  0x2d   : > { %132 = vst.msk [vmem:[%s428_s6 + $0x4] sm:$0x1] %vm107_vm0, %v131_v9  ;;  %s226_s12 = sshll.u32 %s388_s17, 7  ;;  %s165_s18 = sshll.u32 %s428_s6, 4  ;;  %v143_v13 = vmul.f32 5.656854, %v142_v12  ;;  %s466_s18 = int_to_ptr.vmem [resolvable:$true] %s165_s18 }
  0x2e   : > { %s147_s13 = scalar_lea.vmem %s511_s1, %s146_s26  ;;  %138 = vst.msk [vmem:[%s428_s6 + $0x5] sm:$0x1] %vm107_vm0, %v137_v11  ;;  %s464_s5 = scalar_lea.hbm %s512_s2, %s226_s12 }
  0x2f   : > { %v148_v14 = vld [vmem:[%s147_s13] sm:$0x1]  ;;  %144 = vst.msk [vmem:[%s428_s6 + $0x6] sm:$0x1] %vm107_vm0, %v143_v13  ;;  %s519_s17 = sand.u32 1, %s337_s15   ;;  %s281_s22 = scalar_lea.vmem %s466_s18, 128 }
  0x30   : > { %v149_v15 = vmul.f32 5.656854, %v148_v14  ;;  %s152_s26 = scalar_lea.sflag [#allocation5], %s519_s17  ;;  %p282_p1 = scmp.ne.s32.totalorder %s466_s18, %s281_s22 }
  0x31   : > { %s348_s25 = smov [#allocation4]  }
  0x32   : > { %150 = vst.msk [vmem:[%s428_s6 + $0x7] sm:$0x1] %vm107_vm0, %v149_v15  ;;  %p283_p2 = pnand %p282_p1, %p405_p10  ;;  %s285_s0 = sshll.u32 %s348_s25, 4  ;;  %s286_s0 = int_to_ptr.vmem [resolvable:$false] %s285_s0 }
  0x33   : > { %s287_s28 = scalar_lea.vmem %s286_s0, 256  ;;  %p288_p4 = scmp.lt.s32.totalorder %s466_s18, %s286_s0 }
  0x34   : > { %p284_p3 = pneg %p283_p2  ;;  %p289_p5 = scmp.lt.s32.totalorder %s287_s28, %s281_s22 }
  0x36   : > { %p290_p6 = por %p289_p5, %p288_p4 }
  0x38   : > { %p291_p7 = pnand %p290_p6, %p284_p3 }
  0x3a   : > { %294 = shalt.err (!%p291_p7)
}
  0x3b   : > { %s295_s6 = scalar_lea.hbm %s464_s5, 128  ;;  %s299_s4 = scalar_lea.hbm %s512_s2, 256 }
  0x3c   : > { %p296_p8 = scmp.ne.s32.totalorder %s464_s5, %s295_s6  ;;  %p300_p13 = scmp.lt.u32.totalorder %s464_s5, %s512_s2 }
  0x3d   : > { %p301_p0 = scmp.lt.u32.totalorder %s299_s4, %s295_s6  ;;  %p303_p2 = scmp.lt.u32.totalorder %s295_s6, %s464_s5 }
  0x3e   : > { %p297_p9 = pnand %p296_p8, %p405_p10 }
  0x3f   : > { %p302_p1 = por %p301_p0, %p300_p13 }
  0x40   : > { %p298_p12 = pneg %p297_p9 }
  0x41   : > { %p304_p3 = por %p303_p2, %p302_p1 }
  0x43   : > { %p305_p4 = pnand %p304_p3, %p298_p12 }
  0x45   : > { %308 = shalt.err (!%p305_p4)
}
  0x46   : > { %229 = dma.vmem_to_hbm [thread:$0]  (%p405_p10), %s466_s18, 128, %s464_s5, %s152_s26  }
  0x47 PF: > { %p235_p5 = scmp.ge.s32.totalorder %s345_s16, 2  ;;  %s177_s7 = sand.u32 1, %s333_s14  }
  0x48   : > { %s178_s11 = scalar_lea.sflag [#allocation5], %s177_s7 }
  0x49   : > { %p232_p6 = pnand %p235_p5, %p409_p11 }
  0x4b   : > { %328 = dma.done.wait (!%p232_p6), %s178_s11, 128  }
  0x4c   : > { %330 = vsyncadd (!%p232_p6), %s178_s11, 4294967168  ;;  %s520_s8 = sld [smem:[#allocation8_spill]]  ;;  %s521_s0 = sld [smem:[#allocation9_spill]] }
  0x4d   : > { %p18_p7 = scmp.ge.s32.totalorder %s392_s19, 4   ;;  %s522_s14 = smov %s337_s15 }
  0x4e   : > { %s524_s16 = smov %s392_s19 }
  0x4f   :  { %20 = sbr.rel (!%p18_p7) target bundleno = 18 (0x12), region = 64 }
  0x52   : > { %s523_s15 = smov %s520_s8 }
  0x56   :  { %183 = vsyncpa [#allocation5], 1 }
  0x57   :  { %185 = vsyncpa [#allocation5 + $0x1], 1 }

</bundles_post_ra>
